<compile_context>
chip_gen: v6e
topology: v6e:2x2x1
jax: 0.10.0
libtpu: 0.0.40
codegen_flags: <defaults>
</compile_context>

<pallas_src>
import functools

import jax
import jax.numpy as jnp
from jax.experimental import pallas as pl
from jax.experimental.pallas import tpu as pltpu

LANE = 128
NEG_BIG = -1.0e30  # fills padded output columns: exp() underflows to exactly 0


def _round_up(n, m):
    return ((n + m - 1) // m) * m


def mlp_kernel(x_ref, w1_ref, b1_ref, w2_ref, b2_ref, o_ref):
    # First linear (bf16 MXU inputs, f32 accumulation) + bias + ReLU.
    h = jnp.dot(x_ref[...], w1_ref[...], preferred_element_type=jnp.float32)
    h = jnp.maximum(h + b1_ref[...], 0.0)                  # (tb, Hp) f32
    # Second linear.
    logits = jnp.dot(h.astype(w2_ref.dtype), w2_ref[...],
                     preferred_element_type=jnp.float32)
    logits = logits + b2_ref[...]                           # padded cols -> -1e30
    # Numerically stable softmax over the last dim (== PyTorch dim=1).
    m = jnp.max(logits, axis=-1, keepdims=True)
    e = jnp.exp(logits - m)                                  # padded cols -> 0
    denom = jnp.sum(e, axis=-1, keepdims=True)
    # Exact f32 divide: rows sum to 1 up to f32 rounding (approx reciprocal
    # caused >1e-3 row-sum drift).
    o_ref[...] = (e / denom).astype(o_ref.dtype)


@functools.partial(jax.jit, static_argnames=("tb",))
def mlp_forward(x, w1, b1, w2, b2, *, tb=128):
    """x: (B, I) f32; w1: (I, H); b1: (1, H); w2: (H, O); b2: (1, O)."""
    B, I = x.shape
    H = w1.shape[1]
    O = w2.shape[1]

    # Lane-dense padding of every feature dimension (exact for matmul+bias).
    Ip = _round_up(max(I, LANE), LANE)
    Hp = _round_up(max(H, LANE), LANE)
    Op = _round_up(max(O, LANE), LANE)
    Bp = _round_up(B, tb)

    x_p = jnp.pad(x, ((0, Bp - B), (0, Ip - I))).astype(jnp.bfloat16)
    w1_p = jnp.pad(w1, ((0, Ip - I), (0, Hp - H))).astype(jnp.bfloat16)
    b1_p = jnp.pad(b1, ((0, 0), (0, Hp - H))).astype(jnp.float32)
    w2_p = jnp.pad(w2, ((0, Hp - H), (0, Op - O))).astype(jnp.bfloat16)
    # Padded logit columns get a huge negative bias -> exp() == 0 -> softmax exact.
    b2_p = jnp.pad(b2.astype(jnp.float32), ((0, 0), (0, Op - O)),
                   constant_values=NEG_BIG)

    grid = (Bp // tb,)

    cost = pl.CostEstimate(
        flops=2 * Bp * (Ip * Hp + Hp * Op),
        transcendentals=Bp * Op,                        # exp
        bytes_accessed=(x_p.size * 2 + w1_p.size * 2 + w2_p.size * 2
                        + b1_p.size * 4 + b2_p.size * 4 + Bp * Op * 4),
    )

    out_p = pl.pallas_call(
        mlp_kernel,
        out_shape=jax.ShapeDtypeStruct((Bp, Op), jnp.float32),
        grid_spec=pltpu.PrefetchScalarGridSpec(
            num_scalar_prefetch=0,
            grid=grid,
            in_specs=[
                pl.BlockSpec((tb, Ip), lambda i: (i, 0)),   # x tile over batch
                pl.BlockSpec((Ip, Hp), lambda i: (0, 0)),   # W1 resident
                pl.BlockSpec((1, Hp), lambda i: (0, 0)),    # b1 resident
                pl.BlockSpec((Hp, Op), lambda i: (0, 0)),   # W2 resident
                pl.BlockSpec((1, Op), lambda i: (0, 0)),    # b2 resident
            ],
            out_specs=pl.BlockSpec((tb, Op), lambda i: (i, 0)),
        ),
        compiler_params=pltpu.CompilerParams(
            dimension_semantics=("parallel",)),
        cost_estimate=cost,
    )(x_p, w1_p, b1_p, w2_p, b2_p)

    return out_p[:B, :O]


def init_linear_params(key, in_features, out_features):
    # Deterministic init mimicking nn.Linear (uniform in +/- 1/sqrt(in)).
    kw, kb = jax.random.split(key)
    bound = 1.0 / jnp.sqrt(jnp.float32(in_features))
    # Stored as (in, out) == transpose of PyTorch's (out, in) layout.
    w = jax.random.uniform(kw, (in_features, out_features),
                           jnp.float32, -bound, bound)
    b = jax.random.uniform(kb, (1, out_features), jnp.float32, -bound, bound)
    return w, b


if __name__ == "__main__":
    input_size, hidden_size, output_size = 32, 64, 16
    batch = 256        # 2 grid steps at tb=128 -> both v7x TensorCores used

    key = jax.random.PRNGKey(0)
    kx, k1, k2 = jax.random.split(key, 3)

    x = jax.random.normal(kx, (batch, input_size), jnp.float32)
    w1, b1 = init_linear_params(k1, input_size, hidden_size)
    w2, b2 = init_linear_params(k2, hidden_size, output_size)

    out = mlp_forward(x, w1, b1, w2, b2, tb=128)
    out = jax.block_until_ready(out)

    # Reference in plain f32 JAX (same math as the PyTorch module).
    h_ref = jnp.maximum(x @ w1 + b1, 0.0)
    ref = jax.nn.softmax(h_ref @ w2 + b2, axis=1)

    assert out.shape == (batch, output_size)
    # bf16 MXU inputs -> loosened tolerance vs f32 reference.
    assert jnp.allclose(out, ref, atol=2e-2, rtol=2e-2), \
        float(jnp.max(jnp.abs(out - ref)))
    # Exact f32 normalization -> rows sum to 1 within f32 rounding.
    assert jnp.all(jnp.abs(jnp.sum(out, axis=1) - 1.0) < 1e-3)

    print("KERNEL_OK")
</pallas_src>

<mosaic_0001>
module attributes {stable_mosaic.version = 11 : i64} {
  func.func @mlp_kernel(%arg0: i32, %arg1: memref<128x128xbf16, #tpu.memory_space<vmem>>, %arg2: memref<128x128xbf16, #tpu.memory_space<vmem>>, %arg3: memref<1x128xf32, #tpu.memory_space<vmem>>, %arg4: memref<128x128xbf16, #tpu.memory_space<vmem>>, %arg5: memref<1x128xf32, #tpu.memory_space<vmem>>, %arg6: memref<128x128xf32, #tpu.memory_space<vmem>>) attributes {dimension_semantics = [#tpu.dimension_semantics<parallel>], iteration_bounds = array<i64: 2>, scalar_prefetch = 0 : i64, scratch_operands = 0 : i64, tpu.core_type = #tpu.core_type<tc>, window_params = [{transform_indices = @transform_0, window_bounds = array<i64: 128, 128>}, {pipeline_mode = #tpu.pipeline_mode<synchronous>, transform_indices = @transform_1, window_bounds = array<i64: 128, 128>}, {pipeline_mode = #tpu.pipeline_mode<synchronous>, transform_indices = @transform_2, window_bounds = array<i64: 1, 128>}, {pipeline_mode = #tpu.pipeline_mode<synchronous>, transform_indices = @transform_3, window_bounds = array<i64: 128, 128>}, {pipeline_mode = #tpu.pipeline_mode<synchronous>, transform_indices = @transform_4, window_bounds = array<i64: 1, 128>}, {transform_indices = @transform_5, window_bounds = array<i64: 128, 128>}]} {
    %c0 = arith.constant 0 : index
    %c0_0 = arith.constant 0 : index
    %0 = vector.load %arg1[%c0, %c0_0] : memref<128x128xbf16, #tpu.memory_space<vmem>>, vector<128x128xbf16>
    %c0_1 = arith.constant 0 : index
    %c0_2 = arith.constant 0 : index
    %1 = vector.load %arg2[%c0_1, %c0_2] : memref<128x128xbf16, #tpu.memory_space<vmem>>, vector<128x128xbf16>
    %cst = arith.constant dense<0.000000e+00> : vector<128x128xf32>
    %2 = tpu.matmul %0, %1, %cst {dimension_numbers = #tpu.dot_dimension_numbers<[1], [0], [0], [1], [0, 0, 1, 1], [], []>} : vector<128x128xbf16>, vector<128x128xbf16>, vector<128x128xf32> -> vector<128x128xf32>
    %c0_3 = arith.constant 0 : index
    %c0_4 = arith.constant 0 : index
    %3 = vector.load %arg3[%c0_3, %c0_4] : memref<1x128xf32, #tpu.memory_space<vmem>>, vector<1x128xf32>
    %4 = vector.broadcast %3 : vector<1x128xf32> to vector<128x128xf32>
    %5 = arith.addf %2, %4 : vector<128x128xf32>
    %cst_5 = arith.constant 0.000000e+00 : f32
    %6 = vector.broadcast %cst_5 : f32 to vector<128x128xf32>
    %7 = arith.maximumf %5, %6 : vector<128x128xf32>
    %8 = arith.truncf %7 : vector<128x128xf32> to vector<128x128xbf16>
    %c0_6 = arith.constant 0 : index
    %c0_7 = arith.constant 0 : index
    %9 = vector.load %arg4[%c0_6, %c0_7] : memref<128x128xbf16, #tpu.memory_space<vmem>>, vector<128x128xbf16>
    %cst_8 = arith.constant dense<0.000000e+00> : vector<128x128xf32>
    %10 = tpu.matmul %8, %9, %cst_8 {dimension_numbers = #tpu.dot_dimension_numbers<[1], [0], [0], [1], [0, 0, 1, 1], [], []>} : vector<128x128xbf16>, vector<128x128xbf16>, vector<128x128xf32> -> vector<128x128xf32>
    %c0_9 = arith.constant 0 : index
    %c0_10 = arith.constant 0 : index
    %11 = vector.load %arg5[%c0_9, %c0_10] : memref<1x128xf32, #tpu.memory_space<vmem>>, vector<1x128xf32>
    %12 = vector.broadcast %11 : vector<1x128xf32> to vector<128x128xf32>
    %13 = arith.addf %10, %12 : vector<128x128xf32>
    %cst_11 = arith.constant dense<0xFF800000> : vector<128xf32>
    %14 = vector.multi_reduction <maximumf>, %13, %cst_11 [1] : vector<128x128xf32> to vector<128xf32>
    %15 = vector.shape_cast %14 : vector<128xf32> to vector<128x1xf32>
    %16 = vector.broadcast %15 : vector<128x1xf32> to vector<128x128xf32>
    %17 = arith.subf %13, %16 : vector<128x128xf32>
    %18 = math.exp %17 : vector<128x128xf32>
    %cst_12 = arith.constant dense<0.000000e+00> : vector<128xf32>
    %19 = vector.multi_reduction <add>, %18, %cst_12 [1] : vector<128x128xf32> to vector<128xf32>
    %20 = vector.shape_cast %19 : vector<128xf32> to vector<128x1xf32>
    %21 = vector.broadcast %20 : vector<128x1xf32> to vector<128x128xf32>
    %22 = arith.divf %18, %21 : vector<128x128xf32>
    %c0_13 = arith.constant 0 : index
    %c0_14 = arith.constant 0 : index
    %23 = vector.load %arg6[%c0_13, %c0_14] : memref<128x128xf32, #tpu.memory_space<vmem>>, vector<128x128xf32>
    tpu.vector_store %arg6[%c0_13, %c0_14], %22 {strides = array<i32>} : memref<128x128xf32, #tpu.memory_space<vmem>>, vector<128x128xf32>,
    return
  }
  func.func @transform_0(%arg0: i32) -> (i32, i32) {
    %c0_i32 = arith.constant 0 : i32
    %c0_i32_0 = arith.constant 0 : i32
    return %arg0, %c0_i32 : i32, i32
  }
  func.func @transform_1(%arg0: i32) -> (i32, i32) {
    %c0_i32 = arith.constant 0 : i32
    %c0_i32_0 = arith.constant 0 : i32
    %c0_i32_1 = arith.constant 0 : i32
    return %c0_i32, %c0_i32_0 : i32, i32
  }
  func.func @transform_2(%arg0: i32) -> (i32, i32) {
    %c0_i32 = arith.constant 0 : i32
    %c0_i32_0 = arith.constant 0 : i32
    %c0_i32_1 = arith.constant 0 : i32
    return %c0_i32, %c0_i32_0 : i32, i32
  }
  func.func @transform_3(%arg0: i32) -> (i32, i32) {
    %c0_i32 = arith.constant 0 : i32
    %c0_i32_0 = arith.constant 0 : i32
    %c0_i32_1 = arith.constant 0 : i32
    return %c0_i32, %c0_i32_0 : i32, i32
  }
  func.func @transform_4(%arg0: i32) -> (i32, i32) {
    %c0_i32 = arith.constant 0 : i32
    %c0_i32_0 = arith.constant 0 : i32
    %c0_i32_1 = arith.constant 0 : i32
    return %c0_i32, %c0_i32_0 : i32, i32
  }
  func.func @transform_5(%arg0: i32) -> (i32, i32) {
    %c0_i32 = arith.constant 0 : i32
    %c0_i32_0 = arith.constant 0 : i32
    return %arg0, %c0_i32 : i32, i32
  }
}

</mosaic_0001>

<bundles_post_ra>
// kernel: mlp_forward.1
= control target key start
LH: loop header
LB: loop body
LE: loop exit
PB: predicated region body
PF: predicated region fallthrough
CT: control target
= control target key end

     0   :  { %s1136_s18 = smov 0   ;;  %s1331_s0 = inlined_call_operand.vmem [shape: bf16[256,128], index: 0, kind: input, shape index: {}]   ;;  %s1332_s1 = inlined_call_operand.vmem [shape: bf16[128,128], index: 1, kind: input, shape index: {}]   ;;  %s1333_s2 = inlined_call_operand.vmem [shape: f32[1,128], index: 2, kind: input, shape index: {}]   ;;  %s1334_s3 = inlined_call_operand.vmem [shape: bf16[128,128], index: 3, kind: input, shape index: {}]   ;;  %s1335_s4 = inlined_call_operand.vmem [shape: f32[1,128], index: 4, kind: input, shape index: {}]   ;;  %s1336_s5 = inlined_call_operand.vmem [shape: f32[256,128], index: 5, kind: output, shape index: {}]  }
   0x1 LB: > { %s869_s19 = sadd.s32 4294967295, %s1104_s18   ;;  %p873_p0 = scmp.ge.s32.totalorder %s1104_s18, 1  ;;  %s1104_s18 = sphi %s1136_s18, %s15_s18  }
   0x2   : > { %p188_p1 = scmp.lt.s32.totalorder %s1104_s18, 3 }
   0x4   : > { %p189_p2 = pnand %p873_p0, %p188_p1 }
   0x5   : > { %s874_s22 = sshll.u32 (!%p189_p2), %s869_s19, 4 }
   0x6   : > { %192 = sbr.rel (%p189_p2) target bundleno = 790 (0x316), region = 40  ;;  %p217_p3 = scmp.lt.s32.totalorder (!%p189_p2), %s874_s22, 31 }
   0xb   : > { %v1010_v0 = vld [vmem:[%s1332_s1 + $0x38] sm:$0xff]   ;;  %v1011_v1 = vld [vmem:[%s1332_s1 + $0x30] sm:$0xff]   ;;  %s1338_s22 = smov (!%p217_p3, %s874_s22), 31  ;;  %v1012_v2 = vld [vmem:[%s1332_s1 + $0x28] sm:$0xff]  }
   0xc   : > { %938 = vmatprep.subr.bf16.mxu0 %v1010_v0  ;;  %s875_s27 = sshll.u32 %s1338_s22, 2  ;;  %v1013_v3 = vld [vmem:[%s1332_s1 + $0x20] sm:$0xff]   ;;  %v1014_v5 = vld [vmem:[%s1332_s1 + $0x18] sm:$0xff]   ;;  %v1015_v6 = vld [vmem:[%s1332_s1 + $0x10] sm:$0xff]   ;;  %s877_s13 = sshll.u32 %s1338_s22, 3 }
   0xd   : > { %939 = vmatpush3.bf16.msra.mxu0 %v1010_v0  ;;  %s1159_s30 = scalar_lea.vmem %s1331_s0, %s875_s27  ;;  %v1026_v7 = vld [vmem:[%s1334_s3 + $0x38] sm:$0xff]   ;;  %v1027_v8 = vld [vmem:[%s1334_s3 + $0x30] sm:$0xff]   ;;  %v1016_v9 = vld [vmem:[%s1332_s1 + $0x8] sm:$0xff]   ;;  %s1294_s16 = scalar_lea.vmem %s1336_s5, %s877_s13 }
   0xe   : > { %940 = vmatprep.subr.bf16.mxu0 %v1011_v1  ;;  %v1018_v4 = vld [vmem:[%s1159_s30] sm:$0xff]   ;;  %970 = vmatprep.subr.bf16.mxu1 %v1026_v7  ;;  %v1028_v10 = vld [vmem:[%s1334_s3 + $0x28] sm:$0xff]   ;;  %v1030_v13 = vld [vmem:[%s1334_s3 + $0x18] sm:$0xff]  }
   0xf   : > { %954 = vmatprep.mubr.bf16.mxu0 %v1018_v4  ;;  %971 = vmatpush3.bf16.msra.mxu1 %v1026_v7  ;;  %v1017_v11 = vld [vmem:[%s1332_s1] sm:$0xff]   ;;  %v1019_v14 = vld [vmem:[%s1159_s30 + $0x8] sm:$0xff]   ;;  %v1020_v15 = vld [vmem:[%s1159_s30 + $0x10] sm:$0xff]  }
  0x10   : > { %972 = vmatprep.subr.bf16.mxu1 %v1027_v8  ;;  %v1029_v12 = vld [vmem:[%s1334_s3 + $0x20] sm:$0xff]   ;;  %v1021_v16 = vld [vmem:[%s1159_s30 + $0x18] sm:$0xff]   ;;  %v1023_v18 = vld [vmem:[%s1159_s30 + $0x28] sm:$0xff]  }
  0x11   : > { %941 = vmatpush3.bf16.msra.mxu0 %v1011_v1  ;;  %v1022_v17 = vld [vmem:[%s1159_s30 + $0x20] sm:$0xff]   ;;  %v1024_v19 = vld [vmem:[%s1159_s30 + $0x30] sm:$0xff]   ;;  %v1025_v20 = vld [vmem:[%s1159_s30 + $0x38] sm:$0xff]  }
  0x12   : > { %942 = vmatprep.subr.bf16.mxu0 %v1012_v2  ;;  %v1031_v21 = vld [vmem:[%s1334_s3 + $0x10] sm:$0xff]   ;;  %v1032_v22 = vld [vmem:[%s1334_s3 + $0x8] sm:$0xff]   ;;  %v1033_v23 = vld [vmem:[%s1334_s3] sm:$0xff]  }
  0x13   : > { %973 = vmatpush3.bf16.msra.mxu1 %v1027_v8  ;;  %v878_v26 = vld [vmem:[%s1333_s2] ss:$0 sm:$0xff] }
  0x14   : > { %974 = vmatprep.subr.bf16.mxu1 %v1028_v10 }
  0x15   : > { %943 = vmatpush3.bf16.msra.mxu0 %v1012_v2 }
  0x16   : > { %944 = vmatprep.subr.bf16.mxu0 %v1013_v3 }
  0x17   : > { %975 = vmatpush3.bf16.msra.mxu1 %v1028_v10 }
  0x18   : > { %976 = vmatprep.subr.bf16.mxu1 %v1029_v12 }
  0x19   : > { %945 = vmatpush3.bf16.msra.mxu0 %v1013_v3 }
  0x1a   : > { %946 = vmatprep.subr.bf16.mxu0 %v1014_v5 }
  0x1b   : > { %977 = vmatpush3.bf16.msra.mxu1 %v1029_v12 }
  0x1c   : > { %978 = vmatprep.subr.bf16.mxu1 %v1030_v13 }
  0x1d   : > { %947 = vmatpush3.bf16.msra.mxu0 %v1014_v5 }
  0x1e   : > { %948 = vmatprep.subr.bf16.mxu0 %v1015_v6 }
  0x1f   : > { %979 = vmatpush3.bf16.msra.mxu1 %v1030_v13 }
  0x20   : > { %980 = vmatprep.subr.bf16.mxu1 %v1031_v21 }
  0x21   : > { %949 = vmatpush3.bf16.msra.mxu0 %v1015_v6 }
  0x22   : > { %950 = vmatprep.subr.bf16.mxu0 %v1016_v9 }
  0x23   : > { %981 = vmatpush3.bf16.msra.mxu1 %v1031_v21 }
  0x24   : > { %982 = vmatprep.subr.bf16.mxu1 %v1032_v22 }
  0x25   : > { %951 = vmatpush3.bf16.msra.mxu0 %v1016_v9 }
  0x26   : > { %952 = vmatprep.subr.bf16.mxu0 %v1017_v11 }
  0x27   : > { %983 = vmatpush3.bf16.msra.mxu1 %v1032_v22 }
  0x28   : > { %984 = vmatprep.subr.bf16.mxu1 %v1033_v23 }
  0x29   : > { %953 = vmatpush3.bf16.msra.mxu0 %v1017_v11 }
  0x2b   : > { %985 = vmatpush3.bf16.msra.mxu1 %v1033_v23 }
  0x2c   : > { %955 = vmatmul.mubr.bf16.vlgmr.msra.gmra.mxu0 %v1019_v14 }
  0x2d   : > { %958 = vmatprep.mubr.bf16.mxu0 %v1020_v15 }
  0x34   : > { %959 = vmatmul.mubr.bf16.gmra.mxu0 %v1021_v16 }
  0x35   : > { %962 = vmatprep.mubr.bf16.mxu0 %v1022_v17  ;;  %v895_v17 = vld [vmem:[%s1335_s4] ss:$0 sm:$0xff] }
  0x3c   : > { %963 = vmatmul.mubr.bf16.gmra.mxu0 %v1023_v18 }
  0x3d   : > { %966 = vmatprep.mubr.bf16.mxu0 %v1024_v19 }
  0x44   : > { %967 = vmatmul.mubr.bf16.gmra.mxu0 %v1025_v20 }
  0xec   : > { %v956_v24 = vpop.f32.mrf.mxu0 }
  0xed   : > { %v407_v30 = vadd.f32 %v956_v24, %v878_v26 }
  0xee   : > { %v398_v25 = vpop.f32.mrf.mxu0 }
  0xef   : > { %v399_v28 = vadd.f32 %v878_v26, %v398_v25  ;;  %v463_v37 = vmax.f32 %v407_v30, 0.0 }
  0xf0   : > { %v957_v27 = vpop.f32.mrf.mxu0 }
  0xf1   : > { %v410_v29 = vadd.f32 %v957_v27, %v878_v26  ;;  %v461_v35 = vmax.f32 %v399_v28, 0.0 }
  0xf2   : > { %v401_v31 = vpop.f32.mrf.mxu0 }
  0xf3   : > { %v402_v32 = vadd.f32 %v878_v26, %v401_v31  ;;  %v464_v33 = vmax.f32 %v410_v29, 0.0 }
  0xf4   : > { %v960_v34 = vpop.f32.mrf.mxu0 }
  0xf5   : > { %v462_v36 = vmax.f32 %v402_v32, 0.0  ;;  %v478_v40 = vpack.c.bf16 %v464_v33, %v463_v37  ;;  %v423_v44 = vadd.f32 %v960_v34, %v878_v26 }
  0xf6   : > { %v414_v38 = vpop.f32.mrf.mxu0 }
  0xf7   : > { %v477_v39 = vpack.c.bf16 %v462_v36, %v461_v35  ;;  %v415_v42 = vadd.f32 %v878_v26, %v414_v38  ;;  %v467_v51 = vmax.f32 %v423_v44, 0.0 }
  0xf8   : > { %v961_v41 = vpop.f32.mrf.mxu0 }
  0xf9   : > { %v426_v43 = vadd.f32 %v961_v41, %v878_v26  ;;  %986 = vmatprep.mubr.bf16.mxu1 %v477_v39  ;;  %v465_v49 = vmax.f32 %v415_v42, 0.0 }
  0xfa   : > { %v417_v45 = vpop.f32.mrf.mxu0  ;;  %987 = vmatmul.mubr.bf16.vlgmr.msra.gmra.mxu1 %v478_v40 }
  0xfb   : > { %v418_v46 = vadd.f32 %v878_v26, %v417_v45  ;;  %v468_v47 = vmax.f32 %v426_v43, 0.0 }
  0xfc   : > { %v964_v48 = vpop.f32.mrf.mxu0 }
  0xfd   : > { %v466_v50 = vmax.f32 %v418_v46, 0.0  ;;  %v480_v54 = vpack.c.bf16 %v468_v47, %v467_v51  ;;  %v439_v58 = vadd.f32 %v964_v48, %v878_v26 }
  0xfe   : > { %v430_v52 = vpop.f32.mrf.mxu0 }
  0xff   : > { %v479_v53 = vpack.c.bf16 %v466_v50, %v465_v49  ;;  %v431_v56 = vadd.f32 %v878_v26, %v430_v52  ;;  %v471_v1 = vmax.f32 %v439_v58, 0.0 }
 0x100   : > { %v965_v55 = vpop.f32.mrf.mxu0 }
 0x101   : > { %v442_v57 = vadd.f32 %v965_v55, %v878_v26  ;;  %990 = vmatprep.mubr.bf16.mxu1 %v479_v53  ;;  %v469_v63 = vmax.f32 %v431_v56, 0.0 }
 0x102   : > { %v433_v59 = vpop.f32.mrf.mxu0  ;;  %991 = vmatmul.mubr.bf16.gmra.mxu1 %v480_v54 }
 0x103   : > { %v434_v60 = vadd.f32 %v878_v26, %v433_v59  ;;  %v472_v61 = vmax.f32 %v442_v57, 0.0 }
 0x104   : > { %v968_v62 = vpop.f32.mrf.mxu0 }
 0x105   : > { %v470_v0 = vmax.f32 %v434_v60, 0.0  ;;  %v482_v4 = vpack.c.bf16 %v472_v61, %v471_v1  ;;  %v455_v8 = vadd.f32 %v968_v62, %v878_v26 }
 0x106   : > { %v446_v2 = vpop.f32.mrf.mxu0 }
 0x107   : > { %v481_v3 = vpack.c.bf16 %v470_v0, %v469_v63  ;;  %v447_v6 = vadd.f32 %v878_v26, %v446_v2  ;;  %v475_v14 = vmax.f32 %v455_v8, 0.0 }
 0x108   : > { %v969_v5 = vpop.f32.mrf.mxu0 }
 0x109   : > { %v458_v7 = vadd.f32 %v969_v5, %v878_v26  ;;  %994 = vmatprep.mubr.bf16.mxu1 %v481_v3  ;;  %v473_v12 = vmax.f32 %v447_v6, 0.0 }
 0x10a   : > { %v449_v9 = vpop.f32.mrf.mxu0  ;;  %995 = vmatmul.mubr.bf16.gmra.mxu1 %v482_v4 }
 0x10b   : > { %v450_v10 = vadd.f32 %v878_v26, %v449_v9  ;;  %v476_v11 = vmax.f32 %v458_v7, 0.0 }
 0x10d   : > { %v474_v13 = vmax.f32 %v450_v10, 0.0  ;;  %v484_v16 = vpack.c.bf16 %v476_v11, %v475_v14 }
 0x10f   : > { %v483_v15 = vpack.c.bf16 %v474_v13, %v473_v12 }
 0x111   : > { %998 = vmatprep.mubr.bf16.mxu1 %v483_v15 }
 0x112   : > { %999 = vmatmul.mubr.bf16.gmra.mxu1 %v484_v16 }
 0x1ba   : > { %v988_v18 = vpop.f32.mrf.mxu1 }
 0x1bb   : > { %v599_v19 = vadd.f32 %v988_v18, %v895_v17 }
 0x1bc   : > { %v590_v20 = vpop.f32.mrf.mxu1 }
 0x1bd   : > { %v591_v21 = vadd.f32 %v895_v17, %v590_v20  ;;  %657 = vmax.xlane.f32.xlu1 %v599_v19 }
 0x1be   : > { %v989_v22 = vpop.f32.mrf.mxu1 }
 0x1bf   : > { %v602_v23 = vadd.f32 %v989_v22, %v895_v17  ;;  %653 = vmax.xlane.f32.xlu0 %v591_v21 }
 0x1c0   : > { %v593_v24 = vpop.f32.mrf.mxu1 }
 0x1c1   : > { %v594_v25 = vadd.f32 %v895_v17, %v593_v24  ;;  %659 = vmax.xlane.f32.xlu1 %v602_v23 }
 0x1c2   : > { %v992_v26 = vpop.f32.mrf.mxu1 }
 0x1c3   : > { %655 = vmax.xlane.f32.xlu0 %v594_v25  ;;  %v615_v28 = vadd.f32 %v992_v26, %v895_v17 }
 0x1c4   : > { %v606_v27 = vpop.f32.mrf.mxu1 }
 0x1c5   : > { %v607_v32 = vadd.f32 %v895_v17, %v606_v27 }
 0x1c6   : > { %v993_v29 = vpop.f32.mrf.mxu1 }
 0x1c7   : > { %v618_v30 = vadd.f32 %v993_v29, %v895_v17  ;;  %665 = vmax.xlane.f32.xlu0 %v615_v28 }
 0x1c8   : > { %v609_v31 = vpop.f32.mrf.mxu1 }
 0x1c9   : > { %667 = vmax.xlane.f32.xlu1 %v618_v30  ;;  %v610_v34 = vadd.f32 %v895_v17, %v609_v31 }
 0x1ca   : > { %v996_v33 = vpop.f32.mrf.mxu1 }
 0x1cb   : > { %661 = vmax.xlane.f32.xlu0 %v607_v32  ;;  %v631_v36 = vadd.f32 %v996_v33, %v895_v17 }
 0x1cc   : > { %v622_v35 = vpop.f32.mrf.mxu1 }
 0x1cd   : > { %663 = vmax.xlane.f32.xlu1 %v610_v34  ;;  %v1216_v40 = vadd.f32 %v895_v17, %v622_v35 }
 0x1ce   : > { %v997_v37 = vpop.f32.mrf.mxu1 }
 0x1cf   : > { %v1214_v38 = vadd.f32 %v997_v37, %v895_v17  ;;  %673 = vmax.xlane.f32.xlu0 %v631_v36 }
 0x1d0   : > { %v625_v39 = vpop.f32.mrf.mxu1 }
 0x1d1   : > { %675 = vmax.xlane.f32.xlu1 %v1214_v38  ;;  %v1219_v42 = vadd.f32 %v895_v17, %v625_v39 }
 0x1d2   : > { %v1000_v41 = vpop.f32.mrf.mxu1 }
 0x1d3   : > { %669 = vmax.xlane.f32.xlu0 %v1216_v40  ;;  %v1226_v47 = vadd.f32 %v1000_v41, %v895_v17 }
 0x1d4   : > { %v638_v43 = vpop.f32.mrf.mxu1 }
 0x1d5   : > { %v1222_v44 = vadd.f32 %v895_v17, %v638_v43  ;;  %671 = vmax.xlane.f32.xlu1 %v1219_v42 }
 0x1d6   : > { %v1001_v45 = vpop.f32.mrf.mxu1 }
 0x1d7   : > { %677 = vmax.xlane.f32.xlu0 %v1222_v44  ;;  %v1232_v49 = vadd.f32 %v1001_v45, %v895_v17 }
 0x1d8   : > { %v641_v46 = vpop.f32.mrf.mxu1 }
 0x1d9   : > { %v1228_v48 = vadd.f32 %v895_v17, %v641_v46 }
 0x1db   : > { %679 = vmax.xlane.f32.xlu1 %v1228_v48  ;;  %681 = vmax.xlane.f32.xlu0 %v1226_v47 }
 0x1df   : > { %683 = vmax.xlane.f32.xlu1 %v1232_v49 }
 0x246   : > { %v658_v50 = vpop.xlane.xlu1 %657 }
 0x247   : > { %v687_v51 = vsub.f32 %v599_v19, %v658_v50 }
 0x248   : > { %v654_v52 = vpop.xlane.xlu0 %653 }
 0x249   : > { %v705_v53 = vmul.f32 1.442695, %v687_v51  ;;  %v685_v54 = vsub.f32 %v591_v21, %v654_v52 }
 0x24a   : > { %v660_v55 = vpop.xlane.xlu1 %659 }
 0x24b   : > { %1034 = vpow2.f32 %v705_v53  ;;  %v701_v56 = vmul.f32 1.442695, %v685_v54  ;;  %v688_v57 = vsub.f32 %v602_v23, %v660_v55 }
 0x24c   : > { %v656_v58 = vpop.xlane.xlu0 %655 }
 0x24d   : > { %v707_v59 = vmul.f32 1.442695, %v688_v57  ;;  %v686_v60 = vsub.f32 %v594_v25, %v656_v58  ;;  %1036 = vpow2.f32 %v701_v56 }
 0x24f   : > { %1038 = vpow2.f32 %v707_v59  ;;  %v703_v61 = vmul.f32 1.442695, %v686_v60 }
 0x250   : > { %v666_v62 = vpop.xlane.xlu0 %665 }
 0x251   : > { %v691_v63 = vsub.f32 %v615_v28, %v666_v62  ;;  %1040 = vpow2.f32 %v703_v61 }
 0x252   : > { %v668_v0 = vpop.xlane.xlu1 %667 }
 0x253   : > { %v713_v1 = vmul.f32 1.442695, %v691_v63  ;;  %v692_v2 = vsub.f32 %v618_v30, %v668_v0 }
 0x254   : > { %v662_v3 = vpop.xlane.xlu0 %661 }
 0x255   : > { %1042 = vpow2.f32 %v713_v1  ;;  %v715_v4 = vmul.f32 1.442695, %v692_v2  ;;  %v689_v5 = vsub.f32 %v607_v32, %v662_v3 }
 0x256   : > { %v664_v6 = vpop.xlane.xlu1 %663 }
 0x257   : > { %1044 = vpow2.f32 %v715_v4  ;;  %v709_v7 = vmul.f32 1.442695, %v689_v5  ;;  %v690_v8 = vsub.f32 %v610_v34, %v664_v6 }
 0x258   : > { %v1235_v9 = vpop.eup %1034  ;;  %v674_v10 = vpop.xlane.xlu0 %673 }
 0x259   : > { %1046 = vpow2.f32 %v709_v7  ;;  %v711_v11 = vmul.f32 1.442695, %v690_v8  ;;  %v695_v12 = vsub.f32 %v631_v36, %v674_v10  ;;  %737 = vadd.xlane.f32.xlu0 %v1235_v9 }
 0x25a   : > { %v676_v13 = vpop.xlane.xlu1 %675  ;;  %v1238_v14 = vpop.eup %1036 }
 0x25b   : > { %1048 = vpow2.f32 %v711_v11  ;;  %v721_v15 = vmul.f32 1.442695, %v695_v12  ;;  %v696_v16 = vsub.f32 %v1214_v38, %v676_v13 }
 0x25c   : > { %v1241_v17 = vpop.eup %1038  ;;  %v670_v18 = vpop.xlane.xlu0 %669 }
 0x25d   : > { %1050 = vpow2.f32 %v721_v15  ;;  %v723_v19 = vmul.f32 1.442695, %v696_v16  ;;  %v693_v20 = vsub.f32 %v1216_v40, %v670_v18  ;;  %739 = vadd.xlane.f32.xlu1 %v1241_v17  ;;  %733 = vadd.xlane.f32.xlu0 %v1238_v14 }
 0x25e   : > { %v672_v21 = vpop.xlane.xlu1 %671  ;;  %v1247_v24 = vpop.eup %1040 }
 0x25f   : > { %1052 = vpow2.f32 %v723_v19  ;;  %v717_v22 = vmul.f32 1.442695, %v693_v20  ;;  %v694_v23 = vsub.f32 %v1219_v42, %v672_v21 }
 0x260   : > { %v678_v25 = vpop.xlane.xlu0 %677 }
 0x261   : > { %1054 = vpow2.f32 %v717_v22  ;;  %v719_v26 = vmul.f32 1.442695, %v694_v23  ;;  %v697_v27 = vsub.f32 %v1222_v44, %v678_v25  ;;  %735 = vadd.xlane.f32.xlu1 %v1247_v24 }
 0x262   : > { %v1251_v28 = vpop.eup %1042 }
 0x263   : > { %1056 = vpow2.f32 %v719_v26  ;;  %v725_v29 = vmul.f32 1.442695, %v697_v27  ;;  %745 = vadd.xlane.f32.xlu0 %v1251_v28 }
 0x264   : > { %v1254_v30 = vpop.eup %1044  ;;  %v680_v31 = vpop.xlane.xlu1 %679 }
 0x265   : > { %v682_v32 = vpop.xlane.xlu0 %681  ;;  %1058 = vpow2.f32 %v725_v29  ;;  %v698_v33 = vsub.f32 %v1228_v48, %v680_v31  ;;  %747 = vadd.xlane.f32.xlu1 %v1254_v30 }
 0x266   : > { %v699_v34 = vsub.f32 %v1226_v47, %v682_v32  ;;  %v1259_v35 = vpop.eup %1046 }
 0x267   : > { %v727_v36 = vmul.f32 1.442695, %v698_v33  ;;  %741 = vadd.xlane.f32.xlu0 %v1259_v35 }
 0x268   : > { %v729_v37 = vmul.f32 1.442695, %v699_v34  ;;  %v1262_v38 = vpop.eup %1048  ;;  %v684_v39 = vpop.xlane.xlu1 %683 }
 0x269   : > { %1060 = vpow2.f32 %v727_v36  ;;  %v700_v40 = vsub.f32 %v1232_v49, %v684_v39  ;;  %743 = vadd.xlane.f32.xlu1 %v1262_v38 }
 0x26a   : > { %v1266_v41 = vpop.eup %1050  ;;  %1062 = vpow2.f32 %v729_v37 }
 0x26b   : > { %v731_v42 = vmul.f32 1.442695, %v700_v40  ;;  %753 = vadd.xlane.f32.xlu0 %v1266_v41 }
 0x26c   : > { %v1269_v43 = vpop.eup %1052 }
 0x26d   : > { %1064 = vpow2.f32 %v731_v42  ;;  %755 = vadd.xlane.f32.xlu1 %v1269_v43 }
 0x26e   : > { %v1272_v44 = vpop.eup %1054 }
 0x26f   : > { %749 = vadd.xlane.f32.xlu0 %v1272_v44 }
 0x270   : > { %v1275_v45 = vpop.eup %1056 }
 0x271   : > { %751 = vadd.xlane.f32.xlu1 %v1275_v45 }
 0x272   : > { %v1278_v46 = vpop.eup %1058 }
 0x273   : > { %757 = vadd.xlane.f32.xlu0 %v1278_v46 }
 0x276   : > { %v1281_v47 = vpop.eup %1060 }
 0x277   : > { %v1283_v48 = vpop.eup %1062  ;;  %759 = vadd.xlane.f32.xlu1 %v1281_v47 }
 0x278   : > { %761 = vadd.xlane.f32.xlu0 %v1283_v48 }
 0x27a   : > { %v1287_v49 = vpop.eup %1064 }
 0x27b   : > { %763 = vadd.xlane.f32.xlu1 %v1287_v49 }
 0x2e2   : > { %v738_v50 = vpop.xlane.xlu0 %737 }
 0x2e3   : > { %1066 = vrcp.f32 %v738_v50 }
 0x2e6   : > { %v740_v51 = vpop.xlane.xlu1 %739  ;;  %v734_v52 = vpop.xlane.xlu0 %733 }
 0x2e7   : > { %1068 = vrcp.f32 %v740_v51 }
 0x2e8   : > { %1070 = vrcp.f32 %v734_v52 }
 0x2ea   : > { %v736_v53 = vpop.xlane.xlu1 %735 }
 0x2eb   : > { %1072 = vrcp.f32 %v736_v53 }
 0x2ec   : > { %v746_v54 = vpop.xlane.xlu0 %745 }
 0x2ed   : > { %1074 = vrcp.f32 %v746_v54 }
 0x2ee   : > { %v748_v55 = vpop.xlane.xlu1 %747 }
 0x2ef   : > { %1076 = vrcp.f32 %v748_v55 }
 0x2f0   : > { %v1067_v56 = vpop.eup %1066  ;;  %v742_v57 = vpop.xlane.xlu0 %741 }
 0x2f1   : > { %v770_v58 = vmul.f32 %v1067_v56, %v1235_v9  ;;  %1078 = vrcp.f32 %v742_v57 }
 0x2f2   : > { %v744_v59 = vpop.xlane.xlu1 %743 }
 0x2f3   : > { %799 = vst [vmem:[%s1294_s16 + $0x10] sm:$0xff] %v770_v58  ;;  %1080 = vrcp.f32 %v744_v59 }
 0x2f4   : > { %v1069_v60 = vpop.eup %1068  ;;  %v754_v61 = vpop.xlane.xlu0 %753 }
 0x2f5   : > { %v1071_v62 = vpop.eup %1070  ;;  %v772_v63 = vmul.f32 %v1069_v60, %v1241_v17  ;;  %1082 = vrcp.f32 %v754_v61 }
 0x2f6   : > { %v766_v0 = vmul.f32 %v1071_v62, %v1238_v14  ;;  %v756_v1 = vpop.xlane.xlu1 %755 }
 0x2f7   : > { %800 = vst [vmem:[%s1294_s16 + $0x18] sm:$0xff] %v772_v63  ;;  %1084 = vrcp.f32 %v756_v1 }
 0x2f8   : > { %v1073_v2 = vpop.eup %1072  ;;  %797 = vst [vmem:[%s1294_s16] sm:$0xff] %v766_v0  ;;  %v750_v3 = vpop.xlane.xlu0 %749 }
 0x2f9   : > { %v768_v4 = vmul.f32 %v1073_v2, %v1247_v24  ;;  %1086 = vrcp.f32 %v750_v3 }
 0x2fa   : > { %v1075_v5 = vpop.eup %1074  ;;  %v752_v6 = vpop.xlane.xlu1 %751 }
 0x2fb   : > { %798 = vst [vmem:[%s1294_s16 + $0x8] sm:$0xff] %v768_v4  ;;  %v778_v7 = vmul.f32 %v1075_v5, %v1251_v28  ;;  %1088 = vrcp.f32 %v752_v6 }
 0x2fc   : > { %v1077_v8 = vpop.eup %1076  ;;  %v758_v9 = vpop.xlane.xlu0 %757 }
 0x2fd   : > { %803 = vst [vmem:[%s1294_s16 + $0x30] sm:$0xff] %v778_v7  ;;  %v780_v10 = vmul.f32 %v1077_v8, %v1254_v30  ;;  %1090 = vrcp.f32 %v758_v9 }
 0x2fe   : > { %v1079_v11 = vpop.eup %1078 }
 0x2ff   : > { %804 = vst [vmem:[%s1294_s16 + $0x38] sm:$0xff] %v780_v10  ;;  %v774_v12 = vmul.f32 %v1079_v11, %v1259_v35 }
 0x300   : > { %v1081_v13 = vpop.eup %1080  ;;  %v760_v14 = vpop.xlane.xlu1 %759 }
 0x301   : > { %801 = vst [vmem:[%s1294_s16 + $0x20] sm:$0xff] %v774_v12  ;;  %v776_v15 = vmul.f32 %v1081_v13, %v1262_v38  ;;  %1092 = vrcp.f32 %v760_v14  ;;  %v762_v16 = vpop.xlane.xlu0 %761 }
 0x302   : > { %v1083_v17 = vpop.eup %1082  ;;  %1094 = vrcp.f32 %v762_v16 }
 0x303   : > { %802 = vst [vmem:[%s1294_s16 + $0x28] sm:$0xff] %v776_v15  ;;  %v786_v18 = vmul.f32 %v1083_v17, %v1266_v41 }
 0x304   : > { %v1085_v19 = vpop.eup %1084  ;;  %v764_v20 = vpop.xlane.xlu1 %763 }
 0x305   : > { %807 = vst [vmem:[%s1294_s16 + $0x50] sm:$0xff] %v786_v18  ;;  %v788_v21 = vmul.f32 %v1085_v19, %v1269_v43  ;;  %1096 = vrcp.f32 %v764_v20 }
 0x306   : > { %v1087_v22 = vpop.eup %1086 }
 0x307   : > { %808 = vst [vmem:[%s1294_s16 + $0x58] sm:$0xff] %v788_v21  ;;  %v782_v23 = vmul.f32 %v1087_v22, %v1272_v44 }
 0x308   : > { %v1089_v24 = vpop.eup %1088 }
 0x309   : > { %805 = vst [vmem:[%s1294_s16 + $0x40] sm:$0xff] %v782_v23  ;;  %v784_v25 = vmul.f32 %v1089_v24, %v1275_v45 }
 0x30a   : > { %v1091_v26 = vpop.eup %1090 }
 0x30b   : > { %806 = vst [vmem:[%s1294_s16 + $0x48] sm:$0xff] %v784_v25  ;;  %v790_v27 = vmul.f32 %v1091_v26, %v1278_v46 }
 0x30d   : > { %809 = vst [vmem:[%s1294_s16 + $0x60] sm:$0xff] %v790_v27 }
 0x30e   : > { %v1093_v28 = vpop.eup %1092 }
 0x30f   : > { %v1095_v29 = vpop.eup %1094  ;;  %v792_v30 = vmul.f32 %v1093_v28, %v1281_v47 }
 0x310   : > { %v794_v31 = vmul.f32 %v1095_v29, %v1283_v48 }
 0x311   : > { %810 = vst [vmem:[%s1294_s16 + $0x68] sm:$0xff] %v792_v30 }
 0x312   : > { %v1097_v32 = vpop.eup %1096  ;;  %811 = vst [vmem:[%s1294_s16 + $0x70] sm:$0xff] %v794_v31 }
 0x313   : > { %v796_v33 = vmul.f32 %v1097_v32, %v1287_v49 }
 0x315   : > { %812 = vst [vmem:[%s1294_s16 + $0x78] sm:$0xff] %v796_v33 }
 0x316 PF: > { %s15_s18 = sadd.s32 1, %s1104_s18  }
 0x317   : > { %p12_p4 = scmp.ge.s32.totalorder %s15_s18, 4  }
 0x319   :  { %14 = sbr.rel (!%p12_p4) target bundleno = 1 (0x1), region = 70 }

</bundles_post_ra>
